<compile_context>
chip_gen: v7x
topology: tpu7x:2x2x1
jax: 0.10.0
libtpu: 0.0.40
codegen_flags: <defaults>
</compile_context>

<pallas_src>
import math

import jax
import jax.numpy as jnp
from jax.experimental import pallas as pl
from jax.experimental.pallas import tpu as pltpu

_LANE = 128
_MIB = 1024 * 1024
# Per-pallas_call budget for live (double-buffered) blocks.  Conservative so
# the same tile choices fit v5e/v6e and v7x's 64 MiB physical VMEM.
_VMEM_BUDGET = 32 * _MIB


def _round_up(x, m):
    return ((x + m - 1) // m) * m


def _vmem_params(semantics, est_bytes):
    limit = int(min(max(est_bytes * 3 // 2 + 2 * _MIB, 16 * _MIB), 60 * _MIB))
    return pltpu.CompilerParams(
        dimension_semantics=semantics, vmem_limit_bytes=limit)


# --------------------------------------------------------------------------
# VMEM estimates (f32, double-buffered inputs + output block).
# --------------------------------------------------------------------------
def _fused_est(tm, tn, tk, ngroup):
    return 4 * (2 * tm * tk                 # x
                + 4 * ngroup * tn * tk      # W_data + W_maskp
                + 4 * ngroup * tn           # b_data + b_maskp
                + 2 * tm * tn)              # output


def _matmul_est(tm, tn, tk, ngroup):
    return 4 * (2 * tm * tk + 2 * tn * tk + 4 * ngroup * tn + 2 * tm * tn)


def _collapse_est(ngroup, tn, tk):
    return 4 * (4 * ngroup * tn * tk + 2 * tn * tk)


# --------------------------------------------------------------------------
# Fused kernel: collapse groups per weight tile inside the K loop and matmul.
#   y = x @ w_eff.T + b_eff    with   w_eff = sum_g W_d[g] * sigmoid(-W_m[g])
# --------------------------------------------------------------------------
def _fused_kernel(x_ref, wd_ref, wm_ref, bd_ref, bm_ref, o_ref):
    k = pl.program_id(1)

    @pl.when(k == 0)
    def _():
        o_ref[...] = jnp.zeros_like(o_ref)

    # (ngroup, tn, tk) -> (tn, tk): sigmoid on EUP, mul/sum on VPU, both
    # hidden under the MXU / weight-streaming DMA.
    w_eff = jnp.sum(wd_ref[...] * jax.nn.sigmoid(-wm_ref[...]), axis=0)

    # x: (tm, tk) contracted with w_eff: (tn, tk) on dim 1 of both -> (tm, tn);
    # the transpose is consumed directly by the MXU.
    o_ref[...] += jax.lax.dot_general(
        x_ref[...], w_eff,
        dimension_numbers=(((1,), (1,)), ((), ())),
        preferred_element_type=jnp.float32)

    @pl.when(k == pl.num_programs(1) - 1)
    def _():
        o_ref[...] += jnp.sum(
            bd_ref[...] * jax.nn.sigmoid(-bm_ref[...]), axis=0, keepdims=True)


# --------------------------------------------------------------------------
# Two-kernel path (large batch): collapse once, then tiled matmul.
# --------------------------------------------------------------------------
def _collapse_weight_kernel(wd_ref, wm_ref, weff_ref):
    weff_ref[...] = jnp.sum(
        wd_ref[...] * jax.nn.sigmoid(-wm_ref[...]), axis=0
    ).astype(weff_ref.dtype)


def _matmul_kernel(x_ref, w_ref, bd_ref, bm_ref, o_ref):
    k = pl.program_id(2)

    @pl.when(k == 0)
    def _():
        o_ref[...] = jnp.zeros_like(o_ref)

    o_ref[...] += jax.lax.dot_general(
        x_ref[...], w_ref[...],
        dimension_numbers=(((1,), (1,)), ((), ())),
        preferred_element_type=jnp.float32)

    @pl.when(k == pl.num_programs(2) - 1)
    def _():
        o_ref[...] += jnp.sum(
            bd_ref[...] * jax.nn.sigmoid(-bm_ref[...]), axis=0, keepdims=True)


# --------------------------------------------------------------------------
# Wrapper.
# --------------------------------------------------------------------------
def bnlinear_forward(x, w_data, w_maskp, b_data, b_maskp,
                     *, block_m=256, block_n=512, block_k=1024):
    """Eval-mode BNLinear forward.  Output dtype is float32."""
    # TODO(synk): bias=False variant of the module is not wired up here.
    B, in_f = x.shape
    ngroup, out_f, in_f_w = w_data.shape
    assert in_f_w == in_f

    fused = B <= block_m          # single M tile -> fuse collapse into matmul
    tm = B if fused else block_m  # tm == full dim (fused) or multiple of 8

    # N tile: full when it fits, otherwise a 128-multiple.
    tn = out_f if out_f <= block_n else block_n

    if fused:
        def est_fn(tn_, tk_):
            return _fused_est(tm, tn_, tk_, ngroup)
    else:
        def est_fn(tn_, tk_):
            return _matmul_est(tm, tn_, tk_, ngroup)

    # Largest lane-aligned K tile that fits the VMEM budget.
    k_ceil = _round_up(in_f, _LANE)
    tk = _LANE
    for cand in (1024, 512, 384, 256, 128):
        c = min(cand, block_k, k_ceil)
        c -= c % _LANE
        if c >= _LANE and est_fn(tn, c) <= _VMEM_BUDGET:
            tk = c
            break
    while est_fn(tn, tk) > _VMEM_BUDGET and tn > _LANE and tn % 256 == 0:
        tn //= 2   # last resort: shrink N tile (stays a 128 multiple)

    # v7x: 2 TensorCores per chip -- make sure a parallel axis has >=2 blocks
    # when the fused grid would otherwise degenerate to (1, K).
    if fused and tn == out_f and out_f >= 256 and out_f % 256 == 0:
        tn = out_f // 2

    # Zero-pad K to a multiple of tk (zeros contribute nothing to the dot;
    # padded W_maskp entries only ever multiply the zero-padded W_data).
    k_pad = _round_up(in_f, tk)
    pad_k = k_pad - in_f
    if pad_k:
        x = jnp.pad(x, ((0, 0), (0, pad_k)))
        w_data = jnp.pad(w_data, ((0, 0), (0, 0), (0, pad_k)))
        w_maskp = jnp.pad(w_maskp, ((0, 0), (0, 0), (0, pad_k)))
    n_k = k_pad // tk

    if fused:
        grid = (pl.cdiv(out_f, tn), n_k)
        return pl.pallas_call(
            _fused_kernel,
            out_shape=jax.ShapeDtypeStruct((B, out_f), jnp.float32),
            grid_spec=pltpu.PrefetchScalarGridSpec(
                num_scalar_prefetch=0,
                grid=grid,
                in_specs=[
                    pl.BlockSpec((tm, tk), lambda j, k: (0, k)),           # x
                    pl.BlockSpec((ngroup, tn, tk), lambda j, k: (0, j, k)),  # W_data
                    pl.BlockSpec((ngroup, tn, tk), lambda j, k: (0, j, k)),  # W_maskp
                    pl.BlockSpec((ngroup, tn), lambda j, k: (0, j)),       # b_data
                    pl.BlockSpec((ngroup, tn), lambda j, k: (0, j)),       # b_maskp
                ],
                out_specs=pl.BlockSpec((tm, tn), lambda j, k: (0, j)),
            ),
            compiler_params=_vmem_params(
                ("parallel", "arbitrary"), _fused_est(tm, tn, tk, ngroup)),
        )(x, w_data, w_maskp, b_data, b_maskp)

    # ---- two-kernel path: collapse once, then (M, N, K)-tiled matmul ----
    tn_c = out_f if out_f <= 512 else 512
    tk_c = min(k_pad, 1024)
    while _collapse_est(ngroup, tn_c, tk_c) > _VMEM_BUDGET and tk_c > _LANE:
        tk_c = max(_LANE, (tk_c // 2 // _LANE) * _LANE)

    w_eff = pl.pallas_call(
        _collapse_weight_kernel,
        out_shape=jax.ShapeDtypeStruct((out_f, k_pad), w_data.dtype),
        grid_spec=pltpu.PrefetchScalarGridSpec(
            num_scalar_prefetch=0,
            grid=(pl.cdiv(out_f, tn_c), pl.cdiv(k_pad, tk_c)),
            in_specs=[
                pl.BlockSpec((ngroup, tn_c, tk_c), lambda j, k: (0, j, k)),
                pl.BlockSpec((ngroup, tn_c, tk_c), lambda j, k: (0, j, k)),
            ],
            out_specs=pl.BlockSpec((tn_c, tk_c), lambda j, k: (j, k)),
        ),
        compiler_params=_vmem_params(
            ("parallel", "parallel"), _collapse_est(ngroup, tn_c, tk_c)),
    )(w_data, w_maskp)

    grid = (pl.cdiv(B, tm), pl.cdiv(out_f, tn), n_k)
    return pl.pallas_call(
        _matmul_kernel,
        out_shape=jax.ShapeDtypeStruct((B, out_f), jnp.float32),
        grid_spec=pltpu.PrefetchScalarGridSpec(
            num_scalar_prefetch=0,
            grid=grid,
            in_specs=[
                pl.BlockSpec((tm, tk), lambda i, j, k: (i, k)),       # x
                pl.BlockSpec((tn, tk), lambda i, j, k: (j, k)),       # w_eff
                pl.BlockSpec((ngroup, tn), lambda i, j, k: (0, j)),   # b_data
                pl.BlockSpec((ngroup, tn), lambda i, j, k: (0, j)),   # b_maskp
            ],
            out_specs=pl.BlockSpec((tm, tn), lambda i, j, k: (i, j)),
        ),
        compiler_params=_vmem_params(
            ("parallel", "parallel", "arbitrary"),
            _matmul_est(tm, tn, tk, ngroup)),
    )(x, w_eff, b_data, b_maskp)


# --------------------------------------------------------------------------
# Init mirroring BNLinear.__init__ / fix_init.
# --------------------------------------------------------------------------
def arcsigmoid(p):
    return math.log(p / (1.0 - p))


def init_bnlinear_params(key, in_features, out_features, ngroup=4, p=None):
    if p is None:
        p = max(0.75, 1.0 - 1.0 / (ngroup * ngroup))
    init_value = arcsigmoid(p)
    # weight.data ~ U(-bound, bound), bound = sqrt(1 / weight.size(1)) = sqrt(1/out)
    bound = math.sqrt(1.0 / out_features)
    w_data = jax.random.uniform(
        key, (ngroup, out_features, in_features),
        minval=-bound, maxval=bound, dtype=jnp.float32)
    w_maskp = jnp.full((ngroup, out_features, in_features), init_value, jnp.float32)
    b_data = jnp.zeros((ngroup, out_features), jnp.float32)
    b_maskp = jnp.full((ngroup, out_features), init_value, jnp.float32)
    return w_data, w_maskp, b_data, b_maskp


if __name__ == "__main__":
    # TODO(synk): training-mode forward uses a stochastic Bernoulli mask
    # (BernoulliMaskFunction); only the deterministic eval-mode forward is
    # implemented here.
    def reference(x, wd, wm, bd, bm):
        w_eff = jnp.sum(wd * (1.0 - jax.nn.sigmoid(wm)), axis=0)
        b_eff = jnp.sum(bd * (1.0 - jax.nn.sigmoid(bm)), axis=0)
        return x @ w_eff.T + b_eff[None, :]

    key = jax.random.PRNGKey(0)

    # Case 1: small batch -> fused single-pallas_call path.
    B, in_f, out_f, ngroup = 16, 128, 128, 4
    k_x, k_w, key = jax.random.split(key, 3)
    x = jax.random.normal(k_x, (B, in_f), jnp.float32)
    wd, wm, bd, bm = init_bnlinear_params(k_w, in_f, out_f, ngroup=ngroup)
    out = jax.block_until_ready(bnlinear_forward(x, wd, wm, bd, bm))
    ref = reference(x, wd, wm, bd, bm)
    assert out.shape == ref.shape
    assert jnp.allclose(out, ref, atol=5e-4, rtol=5e-4), "fused path mismatch"

    # Case 2: large batch + awkward K -> two-kernel path with K zero-padding.
    B2, in_f2, out_f2, ngroup2 = 512, 200, 256, 3
    k_x2, k_w2, k_b2 = jax.random.split(key, 3)
    x2 = jax.random.normal(k_x2, (B2, in_f2), jnp.float32)
    wd2, wm2, bd2, bm2 = init_bnlinear_params(k_w2, in_f2, out_f2, ngroup=ngroup2)
    bd2 = 0.1 * jax.random.normal(k_b2, bd2.shape, jnp.float32)  # exercise bias
    out2 = jax.block_until_ready(bnlinear_forward(x2, wd2, wm2, bd2, bm2))
    ref2 = reference(x2, wd2, wm2, bd2, bm2)
    assert out2.shape == ref2.shape
    assert jnp.allclose(out2, ref2, atol=5e-4, rtol=5e-4), "two-kernel path mismatch"

    print("KERNEL_OK")
</pallas_src>

<mosaic_0001>
module attributes {stable_mosaic.version = 11 : i64} {
  func.func @_fused_kernel(%arg0: i32, %arg1: i32, %arg2: memref<16x128xf32, #tpu.memory_space<vmem>>, %arg3: memref<4x128x128xf32, #tpu.memory_space<vmem>>, %arg4: memref<4x128x128xf32, #tpu.memory_space<vmem>>, %arg5: memref<4x128xf32, #tpu.memory_space<vmem>>, %arg6: memref<4x128xf32, #tpu.memory_space<vmem>>, %arg7: memref<16x128xf32, #tpu.memory_space<vmem>>) attributes {dimension_semantics = [#tpu.dimension_semantics<parallel>, #tpu.dimension_semantics<arbitrary>], iteration_bounds = array<i64: 1, 1>, scalar_prefetch = 0 : i64, scratch_operands = 0 : i64, tpu.core_type = #tpu.core_type<tc>, window_params = [{transform_indices = @transform_0, window_bounds = array<i64: 16, 128>}, {transform_indices = @transform_1, window_bounds = array<i64: 4, 128, 128>}, {transform_indices = @transform_2, window_bounds = array<i64: 4, 128, 128>}, {transform_indices = @transform_3, window_bounds = array<i64: 4, 128>}, {transform_indices = @transform_4, window_bounds = array<i64: 4, 128>}, {transform_indices = @transform_5, window_bounds = array<i64: 16, 128>}]} {
    %c0_i32 = arith.constant 0 : i32
    %0 = arith.cmpi eq, %arg1, %c0_i32 : i32
    %1 = arith.extui %0 : i1 to i32
    %c0_i32_0 = arith.constant 0 : i32
    %2 = arith.cmpi ne, %1, %c0_i32_0 : i32
    scf.if %2 {
      %cst_17 = arith.constant 0.000000e+00 : f32
      %22 = vector.broadcast %cst_17 : f32 to vector<16x128xf32>
      %c0_18 = arith.constant 0 : index
      %c0_19 = arith.constant 0 : index
      %23 = vector.load %arg7[%c0_18, %c0_19] : memref<16x128xf32, #tpu.memory_space<vmem>>, vector<16x128xf32>
      tpu.vector_store %arg7[%c0_18, %c0_19], %22 {strides = array<i32>} : memref<16x128xf32, #tpu.memory_space<vmem>>, vector<16x128xf32>,
    } else {
    }
    %c0 = arith.constant 0 : index
    %c0_1 = arith.constant 0 : index
    %c0_2 = arith.constant 0 : index
    %3 = vector.load %arg3[%c0, %c0_1, %c0_2] : memref<4x128x128xf32, #tpu.memory_space<vmem>>, vector<4x128x128xf32>
    %c0_3 = arith.constant 0 : index
    %c0_4 = arith.constant 0 : index
    %c0_5 = arith.constant 0 : index
    %4 = vector.load %arg4[%c0_3, %c0_4, %c0_5] : memref<4x128x128xf32, #tpu.memory_space<vmem>>, vector<4x128x128xf32>
    %cst = arith.constant 0.000000e+00 : f32
    %5 = vector.broadcast %cst : f32 to vector<4x128x128xf32>
    %6 = arith.subf %5, %4 : vector<4x128x128xf32>
    %7 = arith.negf %6 : vector<4x128x128xf32>
    %8 = math.exp %7 : vector<4x128x128xf32>
    %cst_6 = arith.constant 1.000000e+00 : f32
    %9 = vector.broadcast %cst_6 : f32 to vector<4x128x128xf32>
    %10 = arith.addf %9, %8 : vector<4x128x128xf32>
    %11 = arith.divf %9, %10 : vector<4x128x128xf32>
    %12 = arith.mulf %3, %11 : vector<4x128x128xf32>
    %cst_7 = arith.constant dense<0.000000e+00> : vector<128x128xf32>
    %13 = vector.multi_reduction <add>, %12, %cst_7 [0] : vector<4x128x128xf32> to vector<128x128xf32>
    %c0_8 = arith.constant 0 : index
    %c0_9 = arith.constant 0 : index
    %14 = vector.load %arg7[%c0_8, %c0_9] : memref<16x128xf32, #tpu.memory_space<vmem>>, vector<16x128xf32>
    %c0_10 = arith.constant 0 : index
    %c0_11 = arith.constant 0 : index
    %15 = vector.load %arg2[%c0_10, %c0_11] : memref<16x128xf32, #tpu.memory_space<vmem>>, vector<16x128xf32>
    %cst_12 = arith.constant dense<0.000000e+00> : vector<16x128xf32>
    %16 = tpu.matmul %15, %13, %cst_12 {dimension_numbers = #tpu.dot_dimension_numbers<[1], [1], [0], [0], [0, 0, 1, 0], [], []>} : vector<16x128xf32>, vector<128x128xf32>, vector<16x128xf32> -> vector<16x128xf32>
    %17 = arith.addf %14, %16 : vector<16x128xf32>
    %c0_13 = arith.constant 0 : index
    %c0_14 = arith.constant 0 : index
    %18 = vector.load %arg7[%c0_13, %c0_14] : memref<16x128xf32, #tpu.memory_space<vmem>>, vector<16x128xf32>
    tpu.vector_store %arg7[%c0_13, %c0_14], %17 {strides = array<i32>} : memref<16x128xf32, #tpu.memory_space<vmem>>, vector<16x128xf32>,
    %c0_i32_15 = arith.constant 0 : i32
    %19 = arith.cmpi eq, %arg1, %c0_i32_15 : i32
    %20 = arith.extui %19 : i1 to i32
    %c0_i32_16 = arith.constant 0 : i32
    %21 = arith.cmpi ne, %20, %c0_i32_16 : i32
    scf.if %21 {
      %c0_17 = arith.constant 0 : index
      %c0_18 = arith.constant 0 : index
      %22 = vector.load %arg7[%c0_17, %c0_18] : memref<16x128xf32, #tpu.memory_space<vmem>>, vector<16x128xf32>
      %c0_19 = arith.constant 0 : index
      %c0_20 = arith.constant 0 : index
      %23 = vector.load %arg5[%c0_19, %c0_20] : memref<4x128xf32, #tpu.memory_space<vmem>>, vector<4x128xf32>
      %c0_21 = arith.constant 0 : index
      %c0_22 = arith.constant 0 : index
      %24 = vector.load %arg6[%c0_21, %c0_22] : memref<4x128xf32, #tpu.memory_space<vmem>>, vector<4x128xf32>
      %cst_23 = arith.constant 0.000000e+00 : f32
      %25 = vector.broadcast %cst_23 : f32 to vector<4x128xf32>
      %26 = arith.subf %25, %24 : vector<4x128xf32>
      %27 = arith.negf %26 : vector<4x128xf32>
      %28 = math.exp %27 : vector<4x128xf32>
      %cst_24 = arith.constant 1.000000e+00 : f32
      %29 = vector.broadcast %cst_24 : f32 to vector<4x128xf32>
      %30 = arith.addf %29, %28 : vector<4x128xf32>
      %31 = arith.divf %29, %30 : vector<4x128xf32>
      %32 = arith.mulf %23, %31 : vector<4x128xf32>
      %cst_25 = arith.constant dense<0.000000e+00> : vector<128xf32>
      %33 = vector.multi_reduction <add>, %32, %cst_25 [0] : vector<4x128xf32> to vector<128xf32>
      %34 = vector.shape_cast %33 : vector<128xf32> to vector<1x128xf32>
      %35 = vector.broadcast %34 : vector<1x128xf32> to vector<16x128xf32>
      %36 = arith.addf %22, %35 : vector<16x128xf32>
      %c0_26 = arith.constant 0 : index
      %c0_27 = arith.constant 0 : index
      %37 = vector.load %arg7[%c0_26, %c0_27] : memref<16x128xf32, #tpu.memory_space<vmem>>, vector<16x128xf32>
      tpu.vector_store %arg7[%c0_26, %c0_27], %36 {strides = array<i32>} : memref<16x128xf32, #tpu.memory_space<vmem>>, vector<16x128xf32>,
    } else {
    }
    return
  }
  func.func @transform_0(%arg0: i32, %arg1: i32) -> (i32, i32) {
    %c0_i32 = arith.constant 0 : i32
    %c0_i32_0 = arith.constant 0 : i32
    return %c0_i32, %arg1 : i32, i32
  }
  func.func @transform_1(%arg0: i32, %arg1: i32) -> (i32, i32, i32) {
    %c0_i32 = arith.constant 0 : i32
    %c0_i32_0 = arith.constant 0 : i32
    return %c0_i32, %arg0, %arg1 : i32, i32, i32
  }
  func.func @transform_2(%arg0: i32, %arg1: i32) -> (i32, i32, i32) {
    %c0_i32 = arith.constant 0 : i32
    %c0_i32_0 = arith.constant 0 : i32
    return %c0_i32, %arg0, %arg1 : i32, i32, i32
  }
  func.func @transform_3(%arg0: i32, %arg1: i32) -> (i32, i32) {
    %c0_i32 = arith.constant 0 : i32
    %c0_i32_0 = arith.constant 0 : i32
    return %c0_i32, %arg0 : i32, i32
  }
  func.func @transform_4(%arg0: i32, %arg1: i32) -> (i32, i32) {
    %c0_i32 = arith.constant 0 : i32
    %c0_i32_0 = arith.constant 0 : i32
    return %c0_i32, %arg0 : i32, i32
  }
  func.func @transform_5(%arg0: i32, %arg1: i32) -> (i32, i32) {
    %c0_i32 = arith.constant 0 : i32
    %c0_i32_0 = arith.constant 0 : i32
    return %c0_i32, %arg0 : i32, i32
  }
}

</mosaic_0001>

<bundles_post_ra>
// kernel: tpu_custom_call.1
= control target key start
LH: loop header
LB: loop body
LE: loop exit
PB: predicated region body
PF: predicated region fallthrough
CT: control target
= control target key end

     0   :  { %10 = vsyncpa [#allocation3], 0  ;;  %s1504_s0 = inlined_call_operand.hbm [shape: f32[16,128], index: 0, kind: input, shape index: {}]   ;;  %s1505_s1 = inlined_call_operand.hbm [shape: f32[4,128,128], index: 1, kind: input, shape index: {}]   ;;  %s1506_s2 = inlined_call_operand.hbm [shape: f32[4,128,128], index: 2, kind: input, shape index: {}]   ;;  %s1507_s3 = inlined_call_operand.vmem [shape: f32[4,128], index: 3, kind: input, shape index: {}]   ;;  %s1508_s4 = inlined_call_operand.vmem [shape: f32[4,128], index: 4, kind: input, shape index: {}]   ;;  %s1509_s5 = inlined_call_operand.hbm [shape: f32[16,128], index: 5, kind: output, shape index: {}]  }
   0x1   :  { %11 = vsyncpa [#allocation6], 0 }
   0x2   :  { %12 = vsyncpa [#allocation4], 0  ;;  %s1395_s18 = smov [#allocation5]   ;;  %s1396_s20 = smov [#allocation2]  }
   0x3   :  { %s30_s19 = sshll.u32 %s1395_s18, 4  ;;  %s18_s21 = sshll.u32 %s1396_s20, 4  ;;  %s31_s19 = int_to_ptr.vmem [resolvable:$true] %s30_s19  ;;  %s1431_s21 = int_to_ptr.vmem [resolvable:$true] %s18_s21 }
   0x4   :  { %s1301_s24 = scalar_lea.hbm %s1505_s1, 8192 }
   0x5   :  { %p1302_p0 = scmp.ne.s32.totalorder %s1505_s1, %s1301_s24  ;;  %p1305_p1 = scmp.lt.u32.totalorder %s1301_s24, %s1505_s1 }
   0x7   :  { %p1307_p2 = pnand %p1305_p1, %p1302_p0 }
   0x9   :  { %1310 = shalt.err (!%p1307_p2)
}
   0xa   :  { %s1311_s29 = scalar_lea.vmem %s31_s19, 8192  ;;  %p1316_p4 = scmp.lt.s32.totalorder %s31_s19, %s31_s19 }
   0xb   :  { %p1312_p3 = scmp.ne.s32.totalorder %s31_s19, %s1311_s29  ;;  %p1317_p5 = scmp.lt.s32.totalorder %s1311_s29, %s1311_s29 }
   0xd   :  { %p1318_p6 = por %p1317_p5, %p1316_p4 }
   0xf   :  { %p1319_p7 = pnand %p1318_p6, %p1312_p3 }
  0x11   :  { %1322 = shalt.err (!%p1319_p7)
}
  0x12   :  { %s1397_s30 = smov 128   ;;  %s1398_s6 = smov 8  }
  0x13   :  { %36 = dma.hbm_to_vmem [thread:$0]  %s1505_s1, 8192, %s31_s19, [#allocation6], %s1397_s30, %s1397_s30, %s1398_s6  }
  0x14   :  { %s1323_s11 = scalar_lea.hbm %s1504_s0, 256 }
  0x15   :  { %p1324_p8 = scmp.ne.s32.totalorder %s1504_s0, %s1323_s11  ;;  %p1327_p9 = scmp.lt.u32.totalorder %s1323_s11, %s1504_s0 }
  0x17   :  { %p1329_p10 = pnand %p1327_p9, %p1324_p8 }
  0x19   :  { %1332 = shalt.err (!%p1329_p10)
}
  0x1a   :  { %s1333_s16 = scalar_lea.vmem %s1431_s21, 256  ;;  %p1338_p12 = scmp.lt.s32.totalorder %s1431_s21, %s1431_s21 }
  0x1b   :  { %p1334_p11 = scmp.ne.s32.totalorder %s1431_s21, %s1333_s16  ;;  %p1339_p13 = scmp.lt.s32.totalorder %s1333_s16, %s1333_s16 }
  0x1d   :  { %p1340_p0 = por %p1339_p13, %p1338_p12 }
  0x1f   :  { %p1341_p1 = pnand %p1340_p0, %p1334_p11 }
  0x21   :  { %1344 = shalt.err (!%p1341_p1)
}
  0x22   :  { %24 = dma.hbm_to_vmem [thread:$0]  %s1504_s0, 256, %s1431_s21, [#allocation3], %s1397_s30, %s1397_s30, %s1398_s6  }
  0x23   :  { %s1399_s18 = smov [#allocation7]   ;;  %s1345_s23 = scalar_lea.hbm %s1506_s2, 8192 }
  0x24   :  { %s42_s19 = sshll.u32 %s1399_s18, 4  ;;  %p1346_p2 = scmp.ne.s32.totalorder %s1506_s2, %s1345_s23  ;;  %s43_s19 = int_to_ptr.vmem [resolvable:$true] %s42_s19 }
  0x25   :  { %p1349_p3 = scmp.lt.u32.totalorder %s1345_s23, %s1506_s2 }
  0x27   :  { %p1351_p4 = pnand %p1349_p3, %p1346_p2 }
  0x29   :  { %1354 = shalt.err (!%p1351_p4)
}
  0x2a   :  { %s1355_s28 = scalar_lea.vmem %s43_s19, 8192  ;;  %p1360_p6 = scmp.lt.s32.totalorder %s43_s19, %s43_s19 }
  0x2b   :  { %p1356_p5 = scmp.ne.s32.totalorder %s43_s19, %s1355_s28  ;;  %p1361_p7 = scmp.lt.s32.totalorder %s1355_s28, %s1355_s28 }
  0x2d   :  { %p1362_p8 = por %p1361_p7, %p1360_p6 }
  0x2f   :  { %p1363_p9 = pnand %p1362_p8, %p1356_p5 }
  0x31   :  { %1366 = shalt.err (!%p1363_p9)
}
  0x32   :  { %48 = dma.hbm_to_vmem [thread:$0]  %s1506_s2, 8192, %s43_s19, [#allocation6], %s1397_s30, %s1397_s30, %s1398_s6  }
  0x33   :  { %1389 = dma.done.wait [#allocation3], 256  }
  0x34   :  { %1390 = vsyncadd [#allocation3], 4294967040 }
  0x35   :  { %1391 = dma.done.wait [#allocation6], 16384  }
  0x36   :  { %1392 = vsyncadd [#allocation6], 4294950912  ;;  %v132_v0 = vld [vmem:[#allocation7] sm:$0xff]  ;;  %v133_v1 = vld [vmem:[#allocation7 + $0x8] sm:$0xff]  ;;  %vm854_vm0 = vcmask 1043456  }
  0x37   :  { %v148_v2 = vld [vmem:[#allocation7 + $0x80] sm:$0xff]  ;;  %v149_v3 = vld [vmem:[#allocation7 + $0x88] sm:$0xff]  ;;  %v196_v4 = vsub.f32 0.0, %v132_v0  ;;  %v197_v8 = vsub.f32 0.0, %v133_v1  ;;  %v134_v24 = vld [vmem:[#allocation7 + $0x10] sm:$0xff] }
  0x38   :  { %v164_v5 = vld [vmem:[#allocation7 + $0x100] sm:$0xff]  ;;  %v165_v6 = vld [vmem:[#allocation7 + $0x108] sm:$0xff]  ;;  %v212_v9 = vsub.f32 0.0, %v148_v2  ;;  %v213_v10 = vsub.f32 0.0, %v149_v3  ;;  %v135_v25 = vld [vmem:[#allocation7 + $0x18] sm:$0xff]  ;;  %v198_v28 = vsub.f32 0.0, %v134_v24 }
  0x39   :  { %v180_v7 = vld [vmem:[#allocation7 + $0x180] sm:$0xff]  ;;  %v181_v11 = vld [vmem:[#allocation7 + $0x188] sm:$0xff]  ;;  %v228_v12 = vsub.f32 0.0, %v164_v5  ;;  %v229_v13 = vsub.f32 0.0, %v165_v6  ;;  %v884_v15 = vmul.f32 -1.442695, %v196_v4 }
  0x3a   :  { %v244_v14 = vsub.f32 0.0, %v180_v7  ;;  %v245_v16 = vsub.f32 0.0, %v181_v11  ;;  %v885_v17 = vmul.f32 -1.442695, %v197_v8  ;;  %v900_v18 = vmul.f32 -1.442695, %v212_v9 }
  0x3b   :  { %1041 = vpow2.f32 %v884_v15  ;;  %v901_v19 = vmul.f32 -1.442695, %v213_v10  ;;  %v916_v20 = vmul.f32 -1.442695, %v228_v12  ;;  %v917_v21 = vmul.f32 -1.442695, %v229_v13 }
  0x3c   :  { %1043 = vpow2.f32 %v885_v17  ;;  %v932_v22 = vmul.f32 -1.442695, %v244_v14  ;;  %v933_v23 = vmul.f32 -1.442695, %v245_v16  ;;  %v150_v26 = vld [vmem:[#allocation7 + $0x90] sm:$0xff]  ;;  %v151_v27 = vld [vmem:[#allocation7 + $0x98] sm:$0xff] }
  0x3d   :  { %1045 = vpow2.f32 %v900_v18  ;;  %v199_v29 = vsub.f32 0.0, %v135_v25  ;;  %v214_v30 = vsub.f32 0.0, %v150_v26  ;;  %v215_v31 = vsub.f32 0.0, %v151_v27  ;;  %v166_v37 = vld [vmem:[#allocation7 + $0x110] sm:$0xff]  ;;  %v167_v40 = vld [vmem:[#allocation7 + $0x118] sm:$0xff]  ;;  %v136_v62 = vld [vmem:[#allocation7 + $0x20] sm:$0xff] }
  0x3e   :  { %1047 = vpow2.f32 %v901_v19  ;;  %v886_v32 = vmul.f32 -1.442695, %v198_v28  ;;  %v182_v43 = vld [vmem:[#allocation7 + $0x190] sm:$0xff]  ;;  %v183_v46 = vld [vmem:[#allocation7 + $0x198] sm:$0xff]  ;;  %v230_v47 = vsub.f32 0.0, %v166_v37  ;;  %v231_v50 = vsub.f32 0.0, %v167_v40 }
  0x3f   :  { %1049 = vpow2.f32 %v916_v20  ;;  %v887_v33 = vmul.f32 -1.442695, %v199_v29  ;;  %v902_v34 = vmul.f32 -1.442695, %v214_v30  ;;  %v903_v35 = vmul.f32 -1.442695, %v215_v31 }
  0x40   :  { %1051 = vpow2.f32 %v917_v21  ;;  %v246_v53 = vsub.f32 0.0, %v182_v43  ;;  %v247_v56 = vsub.f32 0.0, %v183_v46  ;;  %v918_v59 = vmul.f32 -1.442695, %v230_v47  ;;  %v137_v1 = vld [vmem:[#allocation7 + $0x28] sm:$0xff]  ;;  %v152_v4 = vld [vmem:[#allocation7 + $0xa0] sm:$0xff] }
  0x41   :  { %1053 = vpow2.f32 %v932_v22  ;;  %v919_v61 = vmul.f32 -1.442695, %v231_v50  ;;  %v68_v6 = vld [vmem:[#allocation5] sm:$0xff]  ;;  %v153_v8 = vld [vmem:[#allocation7 + $0xa8] sm:$0xff]  ;;  %v200_v9 = vsub.f32 0.0, %v136_v62  ;;  %v201_v14 = vsub.f32 0.0, %v137_v1 }
  0x42   :  { %1055 = vpow2.f32 %v933_v23  ;;  %v934_v0 = vmul.f32 -1.442695, %v246_v53  ;;  %v935_v3 = vmul.f32 -1.442695, %v247_v56  ;;  %v69_v11 = vld [vmem:[#allocation5 + $0x8] sm:$0xff]  ;;  %v168_v13 = vld [vmem:[#allocation7 + $0x120] sm:$0xff] }
  0x43   :  { %1057 = vpow2.f32 %v886_v32  ;;  %v84_v16 = vld [vmem:[#allocation5 + $0x80] sm:$0xff]  ;;  %v216_v18 = vsub.f32 0.0, %v152_v4  ;;  %v85_v20 = vld [vmem:[#allocation5 + $0x88] sm:$0xff]  ;;  %v217_v23 = vsub.f32 0.0, %v153_v8  ;;  %v232_v27 = vsub.f32 0.0, %v168_v13  ;;  %v138_v53 = vld [vmem:[#allocation7 + $0x30] sm:$0xff] }
  0x44   :  { %1059 = vpow2.f32 %v887_v33  ;;  %v100_v25 = vld [vmem:[#allocation5 + $0x100] sm:$0xff]  ;;  %v888_v28 = vmul.f32 -1.442695, %v200_v9  ;;  %v101_v30 = vld [vmem:[#allocation5 + $0x108] sm:$0xff]  ;;  %v889_v32 = vmul.f32 -1.442695, %v201_v14 }
  0x45   :  { %v1042_v36 = vpop.eup %1041  ;;  %1061 = vpow2.f32 %v902_v34  ;;  %v116_v34 = vld [vmem:[#allocation5 + $0x180] sm:$0xff]  ;;  %v904_v37 = vmul.f32 -1.442695, %v216_v18  ;;  %v905_v43 = vmul.f32 -1.442695, %v217_v23  ;;  %v185_v47 = vld [vmem:[#allocation7 + $0x1a8] sm:$0xff] }
  0x46   :  { %v1044_v38 = vpop.eup %1043  ;;  %v452_v39 = vadd.f32 1.0, %v1042_v36  ;;  %1063 = vpow2.f32 %v903_v35  ;;  %v169_v36 = vld [vmem:[#allocation7 + $0x128] sm:$0xff]  ;;  %v202_v1 = vsub.f32 0.0, %v138_v53  ;;  %v139_v9 = vld [vmem:[#allocation7 + $0x38] sm:$0xff]  ;;  %v154_v14 = vld [vmem:[#allocation7 + $0xb0] sm:$0xff] }
  0x47   :  { %v1046_v41 = vpop.eup %1045  ;;  %v453_v42 = vadd.f32 1.0, %v1044_v38  ;;  %v187_v53 = vld [vmem:[#allocation7 + $0x1b8] sm:$0xff] }
  0x48   :  { %v1048_v44 = vpop.eup %1047  ;;  %v468_v45 = vadd.f32 1.0, %v1046_v41  ;;  %1065 = vrcp.f32 %v452_v39  ;;  %v117_v39 = vld [vmem:[#allocation5 + $0x188] sm:$0xff]  ;;  %v890_v18 = vmul.f32 -1.442695, %v202_v1 }
  0x49   :  { %v1050_v48 = vpop.eup %1049  ;;  %v469_v49 = vadd.f32 1.0, %v1048_v44  ;;  %1067 = vrcp.f32 %v453_v42  ;;  %v184_v42 = vld [vmem:[#allocation7 + $0x1a0] sm:$0xff] }
  0x4a   :  { %v1052_v51 = vpop.eup %1051  ;;  %v484_v52 = vadd.f32 1.0, %v1050_v48  ;;  %1069 = vrcp.f32 %v468_v45  ;;  %v920_v48 = vmul.f32 -1.442695, %v232_v27 }
  0x4b   :  { %v1054_v54 = vpop.eup %1053  ;;  %v485_v55 = vadd.f32 1.0, %v1052_v51  ;;  %1071 = vrcp.f32 %v469_v49 }
  0x4c   :  { %v1056_v57 = vpop.eup %1055  ;;  %v500_v58 = vadd.f32 1.0, %v1054_v54  ;;  %1073 = vrcp.f32 %v484_v52  ;;  %v233_v52 = vsub.f32 0.0, %v169_v36 }
  0x4d   :  { %v501_v60 = vadd.f32 1.0, %v1056_v57  ;;  %1075 = vrcp.f32 %v485_v55  ;;  %v1058_v63 = vpop.eup %1057  ;;  %v248_v57 = vsub.f32 0.0, %v184_v42 }
  0x4e   :  { %1077 = vrcp.f32 %v500_v58  ;;  %v1060_v2 = vpop.eup %1059  ;;  %v454_v7 = vadd.f32 1.0, %v1058_v63  ;;  %v921_v4 = vmul.f32 -1.442695, %v233_v52 }
  0x4f   :  { %1079 = vrcp.f32 %v501_v60  ;;  %v1062_v5 = vpop.eup %1061  ;;  %v455_v12 = vadd.f32 1.0, %v1060_v2  ;;  %v936_v8 = vmul.f32 -1.442695, %v248_v57 }
  0x50   :  { %1081 = vpow2.f32 %v918_v59  ;;  %v1064_v10 = vpop.eup %1063  ;;  %v470_v17 = vadd.f32 1.0, %v1062_v5 }
  0x51   :  { %1083 = vpow2.f32 %v919_v61  ;;  %v471_v22 = vadd.f32 1.0, %v1064_v10  ;;  %v249_v61 = vsub.f32 0.0, %v185_v47 }
  0x52   :  { %v1066_v15 = vpop.eup %1065  ;;  %1085 = vpow2.f32 %v934_v0 }
  0x53   :  { %v1068_v19 = vpop.eup %1067  ;;  %v644_v21 = vmul.f32 %v1066_v15, %v68_v6  ;;  %1087 = vpow2.f32 %v935_v3  ;;  %v937_v13 = vmul.f32 -1.442695, %v249_v61 }
  0x54   :  { %v1070_v24 = vpop.eup %1069  ;;  %v645_v26 = vmul.f32 %v1068_v19, %v69_v11  ;;  %1089 = vrcp.f32 %v454_v7  ;;  %v70_v11 = vld [vmem:[#allocation5 + $0x10] sm:$0xff] }
  0x55   :  { %v1072_v29 = vpop.eup %1071  ;;  %v660_v31 = vmul.f32 %v1070_v24, %v84_v16  ;;  %1091 = vrcp.f32 %v455_v12  ;;  %v86_v12 = vld [vmem:[#allocation5 + $0x90] sm:$0xff]  ;;  %v71_v16 = vld [vmem:[#allocation5 + $0x18] sm:$0xff] }
  0x56   :  { %v1074_v33 = vpop.eup %1073  ;;  %v661_v35 = vmul.f32 %v1072_v29, %v85_v20  ;;  %1093 = vrcp.f32 %v470_v17  ;;  %v87_v17 = vld [vmem:[#allocation5 + $0x98] sm:$0xff] }
  0x57   :  { %v1076_v38 = vpop.eup %1075  ;;  %v676_v40 = vmul.f32 %v1074_v33, %v100_v25  ;;  %v708_v41 = vadd.f32 %v660_v31, %v644_v21  ;;  %1095 = vrcp.f32 %v471_v22  ;;  %v155_v20 = vld [vmem:[#allocation7 + $0xb8] sm:$0xff]  ;;  %v203_v21 = vsub.f32 0.0, %v139_v9  ;;  %v170_v25 = vld [vmem:[#allocation7 + $0x130] sm:$0xff] }
  0x58   :  { %v1078_v44 = vpop.eup %1077  ;;  %v677_v45 = vmul.f32 %v1076_v38, %v101_v30  ;;  %v711_v46 = vadd.f32 %v661_v35, %v645_v26  ;;  %1097 = vpow2.f32 %v888_v28  ;;  %v218_v26 = vsub.f32 0.0, %v154_v14  ;;  %v102_v35 = vld [vmem:[#allocation5 + $0x110] sm:$0xff] }
  0x59   :  { %v1080_v49 = vpop.eup %1079  ;;  %v692_v50 = vmul.f32 %v1078_v44, %v116_v34  ;;  %v709_v51 = vadd.f32 %v708_v41, %v676_v40  ;;  %1099 = vpow2.f32 %v889_v32  ;;  %v219_v33 = vsub.f32 0.0, %v155_v20  ;;  %v103_v40 = vld [vmem:[#allocation5 + $0x118] sm:$0xff] }
  0x5a   :  { %v1082_v54 = vpop.eup %1081  ;;  %v693_v55 = vmul.f32 %v1080_v49, %v117_v39  ;;  %v712_v56 = vadd.f32 %v711_v46, %v677_v45  ;;  %1101 = vpow2.f32 %v904_v37  ;;  %v171_v37 = vld [vmem:[#allocation7 + $0x138] sm:$0xff]  ;;  %v234_v38 = vsub.f32 0.0, %v170_v25  ;;  %v118_v45 = vld [vmem:[#allocation5 + $0x190] sm:$0xff]  ;;  %v89_v25 = vld [vmem:[#allocation5 + $0xa8] sm:$0xff] }
  0x5b   :  { %v1084_v58 = vpop.eup %1083  ;;  %v710_v59 = vadd.f32 %v709_v51, %v692_v50  ;;  %v486_v60 = vadd.f32 1.0, %v1082_v54  ;;  %1103 = vpow2.f32 %v905_v43  ;;  %v891_v43 = vmul.f32 -1.442695, %v203_v21  ;;  %v119_v51 = vld [vmem:[#allocation5 + $0x198] sm:$0xff]  ;;  %v88_v21 = vld [vmem:[#allocation5 + $0xa0] sm:$0xff] }
  0x5c   :  { %v1086_v62 = vpop.eup %1085  ;;  %v713_v63 = vadd.f32 %v712_v56, %v693_v55  ;;  %v487_v0 = vadd.f32 1.0, %v1084_v58  ;;  %1105 = vpow2.f32 %v920_v48  ;;  %v186_v48 = vld [vmem:[#allocation7 + $0x1b0] sm:$0xff]  ;;  %v906_v49 = vmul.f32 -1.442695, %v218_v26 }
  0x5d   :  { %v1088_v2 = vpop.eup %1087  ;;  %v502_v3 = vadd.f32 1.0, %v1086_v62  ;;  %1107 = vrcp.f32 %v486_v60  ;;  %v235_v54 = vsub.f32 0.0, %v171_v37  ;;  %v907_v55 = vmul.f32 -1.442695, %v219_v33 }
  0x5e   :  { %v1090_v5 = vpop.eup %1089  ;;  %v1002_v6 = vpack.c.bf16 %v713_v63, %v710_v59  ;;  %v503_v7 = vadd.f32 1.0, %v1088_v2  ;;  %1109 = vrcp.f32 %v487_v0  ;;  %v922_v58 = vmul.f32 -1.442695, %v234_v38  ;;  %v758_v59 = vld [vmem:[#allocation2] sm:$0xff]  ;;  %v140_v0 = vld [vmem:[#allocation7 + $0x40] sm:$0xff] }
  0x5f   :  { %v1092_v10 = vpop.eup %1091  ;;  %1111 = vrcp.f32 %v502_v3  ;;  %v646_v23 = vmul.f32 %v1090_v5, %v70_v11  ;;  %v250_v63 = vsub.f32 0.0, %v186_v48  ;;  %999 = vmatprep.mubr.f32.mxu0 %v758_v59  ;;  %v141_v5 = vld [vmem:[#allocation7 + $0x48] sm:$0xff]  ;;  %v923_v9 = vmul.f32 -1.442695, %v235_v54 }
  0x60   :  { %v1094_v15 = vpop.eup %1093  ;;  %1003 = vmatprep.subr.bf16.mxu0 %v1002_v6  ;;  %1113 = vrcp.f32 %v503_v7  ;;  %v647_v28 = vmul.f32 %v1092_v10, %v71_v16  ;;  %v204_v14 = vsub.f32 0.0, %v140_v0  ;;  %v121_v59 = vld [vmem:[#allocation5 + $0x1a8] sm:$0xff] }
  0x61   :  { %v1096_v19 = vpop.eup %1095  ;;  %1005 = vmatpush3.bf16.xpose.msra.mxu0 %v1002_v6  ;;  %1115 = vpow2.f32 %v921_v4  ;;  %v662_v24 = vmul.f32 %v1094_v15, %v86_v12  ;;  %v251_v4 = vsub.f32 0.0, %v187_v53  ;;  %v72_v12 = vld [vmem:[#allocation5 + $0x20] sm:$0xff] }
  0x62   :  { %v1098_v22 = vpop.eup %1097  ;;  %1117 = vpow2.f32 %v936_v8  ;;  %v663_v29 = vmul.f32 %v1096_v19, %v87_v17  ;;  %v938_v17 = vmul.f32 -1.442695, %v250_v63  ;;  %v120_v53 = vld [vmem:[#allocation5 + $0x1a0] sm:$0xff] }
  0x63   :  { %v1100_v27 = vpop.eup %1099  ;;  %1119 = vpow2.f32 %v937_v13  ;;  %v456_v30 = vadd.f32 1.0, %v1098_v22  ;;  %v714_v41 = vadd.f32 %v662_v24, %v646_v23  ;;  %v939_v22 = vmul.f32 -1.442695, %v251_v4  ;;  %v73_v24 = vld [vmem:[#allocation5 + $0x28] sm:$0xff] }
  0x64   :  { %v1102_v31 = vpop.eup %1101  ;;  %v457_v32 = vadd.f32 1.0, %v1100_v27  ;;  %1121 = vpow2.f32 %v890_v18  ;;  %v717_v46 = vadd.f32 %v663_v29, %v647_v28  ;;  %v205_v18 = vsub.f32 0.0, %v141_v5  ;;  %v156_v28 = vld [vmem:[#allocation7 + $0xc0] sm:$0xff] }
  0x65   :  { %v1104_v34 = vpop.eup %1103  ;;  %v472_v36 = vadd.f32 1.0, %v1102_v31  ;;  %1123 = vrcp.f32 %v456_v30  ;;  %v104_v30 = vld [vmem:[#allocation5 + $0x120] sm:$0xff]  ;;  %v157_v31 = vld [vmem:[#allocation7 + $0xc8] sm:$0xff] }
  0x66   :  { %v1106_v39 = vpop.eup %1105  ;;  %v473_v42 = vadd.f32 1.0, %v1104_v34  ;;  %1125 = vrcp.f32 %v457_v32  ;;  %v892_v32 = vmul.f32 -1.442695, %v204_v14 }
  0x67   :  { %v1108_v44 = vpop.eup %1107  ;;  %v488_v47 = vadd.f32 1.0, %v1106_v39  ;;  %1127 = vrcp.f32 %v472_v36  ;;  %v893_v36 = vmul.f32 -1.442695, %v205_v18 }
  0x68   :  { %v1110_v50 = vpop.eup %1109  ;;  %v678_v52 = vmul.f32 %v1108_v44, %v102_v35  ;;  %1129 = vrcp.f32 %v473_v42  ;;  %v172_v35 = vld [vmem:[#allocation7 + $0x140] sm:$0xff]  ;;  %v221_v44 = vsub.f32 0.0, %v157_v31  ;;  %v75_v31 = vld [vmem:[#allocation5 + $0x38] sm:$0xff] }
  0x69   :  { %v1112_v56 = vpop.eup %1111  ;;  %v679_v57 = vmul.f32 %v1110_v50, %v103_v40  ;;  %1131 = vrcp.f32 %v488_v47  ;;  %v220_v40 = vsub.f32 0.0, %v156_v28  ;;  %v236_v47 = vsub.f32 0.0, %v172_v35  ;;  %v158_v28 = vld [vmem:[#allocation7 + $0xd0] sm:$0xff]  ;;  %v91_v35 = vld [vmem:[#allocation5 + $0xb8] sm:$0xff] }
  0x6a   :  { %v1114_v60 = vpop.eup %1113  ;;  %v694_v61 = vmul.f32 %v1112_v56, %v118_v45  ;;  %v715_v62 = vadd.f32 %v714_v41, %v678_v52  ;;  %1133 = vpow2.f32 %v891_v43  ;;  %v188_v56 = vld [vmem:[#allocation7 + $0x1c0] sm:$0xff]  ;;  %v909_v63 = vmul.f32 -1.442695, %v221_v44 }
  0x6b   :  { %v1116_v1 = vpop.eup %1115  ;;  %v695_v2 = vmul.f32 %v1114_v60, %v119_v51  ;;  %v718_v3 = vadd.f32 %v717_v46, %v679_v57  ;;  %1135 = vpow2.f32 %v906_v49  ;;  %v105_v49 = vld [vmem:[#allocation5 + $0x128] sm:$0xff]  ;;  %v908_v57 = vmul.f32 -1.442695, %v220_v40  ;;  %v106_v40 = vld [vmem:[#allocation5 + $0x130] sm:$0xff] }
  0x6c   :  { %v1118_v6 = vpop.eup %1117  ;;  %v716_v7 = vadd.f32 %v715_v62, %v694_v61  ;;  %v489_v8 = vadd.f32 1.0, %v1116_v1  ;;  %1137 = vpow2.f32 %v907_v55  ;;  %v173_v51 = vld [vmem:[#allocation7 + $0x148] sm:$0xff] }
  0x6d   :  { %v1120_v10 = vpop.eup %1119  ;;  %v719_v11 = vadd.f32 %v718_v3, %v695_v2  ;;  %v504_v13 = vadd.f32 1.0, %v1118_v6  ;;  %1139 = vpow2.f32 %v922_v58  ;;  %v189_v62 = vld [vmem:[#allocation7 + $0x1c8] sm:$0xff]  ;;  %v237_v2 = vsub.f32 0.0, %v173_v51 }
  0x6e   :  { %v1122_v15 = vpop.eup %1121  ;;  %v505_v16 = vadd.f32 1.0, %v1120_v10  ;;  %1141 = vrcp.f32 %v489_v8  ;;  %v924_v3 = vmul.f32 -1.442695, %v236_v47  ;;  %v252_v6 = vsub.f32 0.0, %v188_v56  ;;  %v107_v56 = vld [vmem:[#allocation5 + $0x138] sm:$0xff] }
  0x6f   :  { %v1124_v19 = vpop.eup %1123  ;;  %v1006_v20 = vpack.c.bf16 %v719_v11, %v716_v7  ;;  %1143 = vrcp.f32 %v504_v13  ;;  %v458_v27 = vadd.f32 1.0, %v1122_v15  ;;  %v253_v10 = vsub.f32 0.0, %v189_v62  ;;  %v142_v11 = vld [vmem:[#allocation7 + $0x50] sm:$0xff]  ;;  %v143_v15 = vld [vmem:[#allocation7 + $0x58] sm:$0xff] }
  0x70   :  { %v1126_v23 = vpop.eup %1125  ;;  %1145 = vrcp.f32 %v505_v16  ;;  %v648_v26 = vmul.f32 %v1124_v19, %v72_v12  ;;  %v925_v19 = vmul.f32 -1.442695, %v237_v2  ;;  %v123_v2 = vld [vmem:[#allocation5 + $0x1b8] sm:$0xff] }
  0x71   :  { %v1128_v29 = vpop.eup %1127  ;;  %1007 = vmatprep.subr.bf16.mxu0 %v1006_v20  ;;  %1147 = vpow2.f32 %v923_v9  ;;  %v649_v38 = vmul.f32 %v1126_v23, %v73_v24  ;;  %v940_v23 = vmul.f32 -1.442695, %v252_v6  ;;  %v206_v24 = vsub.f32 0.0, %v142_v11 }
  0x72   :  { %v1130_v33 = vpop.eup %1129  ;;  %1009 = vmatpush3.bf16.xpose.msra.mxu0 %v1006_v20  ;;  %v664_v34 = vmul.f32 %v1128_v29, %v88_v21  ;;  %1149 = vpow2.f32 %v938_v17  ;;  %v74_v21 = vld [vmem:[#allocation5 + $0x30] sm:$0xff]  ;;  %v207_v29 = vsub.f32 0.0, %v143_v15 }
  0x73   :  { %v1132_v37 = vpop.eup %1131  ;;  %v665_v39 = vmul.f32 %v1130_v33, %v89_v25  ;;  %1151 = vpow2.f32 %v939_v22 }
  0x74   :  { %v1134_v41 = vpop.eup %1133  ;;  %v680_v42 = vmul.f32 %v1132_v37, %v104_v30  ;;  %v720_v43 = vadd.f32 %v664_v34, %v648_v26  ;;  %1153 = vrcp.f32 %v458_v27  ;;  %v941_v27 = vmul.f32 -1.442695, %v253_v10 }
  0x75   :  { %v1136_v45 = vpop.eup %1135  ;;  %v459_v46 = vadd.f32 1.0, %v1134_v41  ;;  %1155 = vpow2.f32 %v892_v32  ;;  %v723_v54 = vadd.f32 %v665_v39, %v649_v38  ;;  %v90_v32 = vld [vmem:[#allocation5 + $0xb0] sm:$0xff]  ;;  %v159_v38 = vld [vmem:[#allocation7 + $0xd8] sm:$0xff]  ;;  %v895_v47 = vmul.f32 -1.442695, %v207_v29 }
  0x76   :  { %v1138_v48 = vpop.eup %1137  ;;  %v474_v50 = vadd.f32 1.0, %v1136_v45  ;;  %1157 = vpow2.f32 %v893_v36  ;;  %v721_v60 = vadd.f32 %v720_v43, %v680_v42  ;;  %v174_v41 = vld [vmem:[#allocation7 + $0x150] sm:$0xff]  ;;  %v222_v42 = vsub.f32 0.0, %v158_v28  ;;  %v76_v28 = vld [vmem:[#allocation5 + $0x40] sm:$0xff] }
  0x77   :  { %v1140_v52 = vpop.eup %1139  ;;  %v475_v55 = vadd.f32 1.0, %v1138_v48  ;;  %1159 = vrcp.f32 %v459_v46  ;;  %v894_v43 = vmul.f32 -1.442695, %v206_v24 }
  0x78   :  { %v1142_v58 = vpop.eup %1141  ;;  %v490_v61 = vadd.f32 1.0, %v1140_v52  ;;  %1161 = vrcp.f32 %v474_v50  ;;  %v223_v50 = vsub.f32 0.0, %v159_v38  ;;  %v77_v38 = vld [vmem:[#allocation5 + $0x48] sm:$0xff] }
  0x79   :  { %v1144_v0 = vpop.eup %1143  ;;  %v681_v1 = vmul.f32 %v1142_v58, %v105_v49  ;;  %1163 = vrcp.f32 %v475_v55  ;;  %v175_v58 = vld [vmem:[#allocation7 + $0x158] sm:$0xff] }
  0x7a   :  { %v1146_v4 = vpop.eup %1145  ;;  %v696_v5 = vmul.f32 %v1144_v0, %v120_v53  ;;  %1165 = vrcp.f32 %v490_v61  ;;  %v910_v0 = vmul.f32 -1.442695, %v222_v42  ;;  %v911_v6 = vmul.f32 -1.442695, %v223_v50 }
  0x7b   :  { %v1148_v7 = vpop.eup %1147  ;;  %v697_v8 = vmul.f32 %v1146_v4, %v121_v59  ;;  %v724_v9 = vadd.f32 %v723_v54, %v681_v1  ;;  %1167 = vpow2.f32 %v908_v57  ;;  %v238_v54 = vsub.f32 0.0, %v174_v41  ;;  %v93_v41 = vld [vmem:[#allocation5 + $0xc8] sm:$0xff] }
  0x7c   :  { %v1150_v12 = vpop.eup %1149  ;;  %v722_v13 = vadd.f32 %v721_v60, %v696_v5  ;;  %v491_v14 = vadd.f32 1.0, %v1148_v7  ;;  %1169 = vpow2.f32 %v909_v63  ;;  %v122_v60 = vld [vmem:[#allocation5 + $0x1b0] sm:$0xff]  ;;  %v191_v5 = vld [vmem:[#allocation7 + $0x1d8] sm:$0xff] }
  0x7d   :  { %v1152_v16 = vpop.eup %1151  ;;  %v725_v17 = vadd.f32 %v724_v9, %v697_v8  ;;  %v506_v18 = vadd.f32 1.0, %v1150_v12  ;;  %1171 = vpow2.f32 %v924_v3  ;;  %v190_v63 = vld [vmem:[#allocation7 + $0x1d0] sm:$0xff]  ;;  %v239_v9 = vsub.f32 0.0, %v175_v58 }
  0x7e   :  { %v1154_v20 = vpop.eup %1153  ;;  %v507_v22 = vadd.f32 1.0, %v1152_v16  ;;  %1173 = vrcp.f32 %v491_v14  ;;  %v926_v10 = vmul.f32 -1.442695, %v238_v54 }
  0x7f   :  { %v1156_v25 = vpop.eup %1155  ;;  %v1010_v26 = vpack.c.bf16 %v725_v17, %v722_v13  ;;  %1175 = vrcp.f32 %v506_v18  ;;  %v650_v36 = vmul.f32 %v1154_v20, %v74_v21  ;;  %v254_v13 = vsub.f32 0.0, %v190_v63  ;;  %v144_v18 = vld [vmem:[#allocation7 + $0x60] sm:$0xff]  ;;  %v109_v63 = vld [vmem:[#allocation5 + $0x148] sm:$0xff] }
  0x80   :  { %v1158_v30 = vpop.eup %1157  ;;  %1177 = vrcp.f32 %v507_v22  ;;  %v460_v33 = vadd.f32 1.0, %v1156_v25  ;;  %v255_v17 = vsub.f32 0.0, %v191_v5  ;;  %v145_v22 = vld [vmem:[#allocation7 + $0x68] sm:$0xff] }
  0x81   :  { %v1160_v34 = vpop.eup %1159  ;;  %1011 = vmatprep.subr.bf16.mxu0 %v1010_v26  ;;  %1179 = vpow2.f32 %v925_v19  ;;  %v461_v37 = vadd.f32 1.0, %v1158_v30  ;;  %v942_v30 = vmul.f32 -1.442695, %v254_v13 }
  0x82   :  { %v1162_v39 = vpop.eup %1161  ;;  %1013 = vmatpush3.bf16.xpose.msra.mxu0 %v1010_v26  ;;  %1181 = vpow2.f32 %v940_v23  ;;  %v651_v45 = vmul.f32 %v1160_v34, %v75_v31  ;;  %v927_v26 = vmul.f32 -1.442695, %v239_v9  ;;  %v208_v31 = vsub.f32 0.0, %v144_v18  ;;  %v125_v9 = vld [vmem:[#allocation5 + $0x1c8] sm:$0xff] }
  0x83   :  { %v1164_v44 = vpop.eup %1163  ;;  %v666_v46 = vmul.f32 %v1162_v39, %v90_v32  ;;  %1183 = vpow2.f32 %v941_v27  ;;  %v943_v34 = vmul.f32 -1.442695, %v255_v17  ;;  %v92_v39 = vld [vmem:[#allocation5 + $0xc0] sm:$0xff] }
  0x84   :  { %v1166_v48 = vpop.eup %1165  ;;  %v667_v49 = vmul.f32 %v1164_v44, %v91_v35  ;;  %1185 = vrcp.f32 %v460_v33  ;;  %v160_v35 = vld [vmem:[#allocation7 + $0xe0] sm:$0xff]  ;;  %v161_v44 = vld [vmem:[#allocation7 + $0xe8] sm:$0xff]  ;;  %v896_v50 = vmul.f32 -1.442695, %v208_v31 }
  0x85   :  { %v1168_v51 = vpop.eup %1167  ;;  %v682_v52 = vmul.f32 %v1166_v48, %v106_v40  ;;  %v726_v53 = vadd.f32 %v666_v46, %v650_v36  ;;  %1187 = vrcp.f32 %v461_v37  ;;  %v209_v36 = vsub.f32 0.0, %v145_v22  ;;  %v108_v46 = vld [vmem:[#allocation5 + $0x140] sm:$0xff] }
  0x86   :  { %v1170_v55 = vpop.eup %1169  ;;  %v476_v57 = vadd.f32 1.0, %v1168_v51  ;;  %1189 = vpow2.f32 %v894_v43  ;;  %v729_v61 = vadd.f32 %v667_v49, %v651_v45  ;;  %v176_v48 = vld [vmem:[#allocation7 + $0x160] sm:$0xff]  ;;  %v224_v49 = vsub.f32 0.0, %v160_v35  ;;  %v78_v35 = vld [vmem:[#allocation5 + $0x50] sm:$0xff] }
  0x87   :  { %v1172_v59 = vpop.eup %1171  ;;  %v477_v62 = vadd.f32 1.0, %v1170_v55  ;;  %1191 = vpow2.f32 %v895_v47  ;;  %v727_v3 = vadd.f32 %v726_v53, %v682_v52  ;;  %v897_v54 = vmul.f32 -1.442695, %v209_v36 }
  0x88   :  { %v1174_v1 = vpop.eup %1173  ;;  %v492_v4 = vadd.f32 1.0, %v1172_v59  ;;  %1193 = vrcp.f32 %v476_v57  ;;  %v225_v57 = vsub.f32 0.0, %v161_v44 }
  0x89   :  { %v1176_v7 = vpop.eup %1175  ;;  %v683_v8 = vmul.f32 %v1174_v1, %v107_v56  ;;  %1195 = vrcp.f32 %v477_v62  ;;  %v177_v1 = vld [vmem:[#allocation7 + $0x168] sm:$0xff] }
  0x8a   :  { %v1178_v11 = vpop.eup %1177  ;;  %v698_v12 = vmul.f32 %v1176_v7, %v122_v60  ;;  %1197 = vrcp.f32 %v492_v4  ;;  %v912_v7 = vmul.f32 -1.442695, %v224_v49  ;;  %v913_v13 = vmul.f32 -1.442695, %v225_v57 }
  0x8b   :  { %v1180_v14 = vpop.eup %1179  ;;  %v699_v15 = vmul.f32 %v1178_v11, %v123_v2  ;;  %v730_v16 = vadd.f32 %v729_v61, %v683_v8  ;;  %1199 = vpow2.f32 %v910_v0  ;;  %v240_v61 = vsub.f32 0.0, %v176_v48  ;;  %v95_v48 = vld [vmem:[#allocation5 + $0xd8] sm:$0xff] }
  0x8c   :  { %v1182_v19 = vpop.eup %1181  ;;  %v728_v20 = vadd.f32 %v727_v3, %v698_v12  ;;  %v493_v21 = vadd.f32 1.0, %v1180_v14  ;;  %1201 = vpow2.f32 %v911_v6  ;;  %v124_v3 = vld [vmem:[#allocation5 + $0x1c0] sm:$0xff]  ;;  %v193_v12 = vld [vmem:[#allocation7 + $0x1e8] sm:$0xff] }
  0x8d   :  { %v1184_v23 = vpop.eup %1183  ;;  %v731_v24 = vadd.f32 %v730_v16, %v699_v15  ;;  %v508_v25 = vadd.f32 1.0, %v1182_v19  ;;  %1203 = vpow2.f32 %v926_v10  ;;  %v192_v6 = vld [vmem:[#allocation7 + $0x1e0] sm:$0xff]  ;;  %v241_v16 = vsub.f32 0.0, %v177_v1 }
  0x8e   :  { %v1186_v27 = vpop.eup %1185  ;;  %v509_v29 = vadd.f32 1.0, %v1184_v23  ;;  %1205 = vrcp.f32 %v493_v21  ;;  %v928_v17 = vmul.f32 -1.442695, %v240_v61 }
  0x8f   :  { %v1188_v32 = vpop.eup %1187  ;;  %v1014_v33 = vpack.c.bf16 %v731_v24, %v728_v20  ;;  %1207 = vrcp.f32 %v508_v25  ;;  %v652_v42 = vmul.f32 %v1186_v27, %v76_v28  ;;  %v256_v20 = vsub.f32 0.0, %v192_v6  ;;  %v146_v25 = vld [vmem:[#allocation7 + $0x70] sm:$0xff]  ;;  %v111_v6 = vld [vmem:[#allocation5 + $0x158] sm:$0xff] }
  0x90   :  { %v1190_v37 = vpop.eup %1189  ;;  %1209 = vrcp.f32 %v509_v29  ;;  %v653_v52 = vmul.f32 %v1188_v32, %v77_v38  ;;  %v257_v24 = vsub.f32 0.0, %v193_v12  ;;  %v147_v29 = vld [vmem:[#allocation7 + $0x78] sm:$0xff]  ;;  %v210_v38 = vsub.f32 0.0, %v146_v25 }
  0x91   :  { %v1192_v40 = vpop.eup %1191  ;;  %1015 = vmatprep.subr.bf16.mxu0 %v1014_v33  ;;  %1211 = vpow2.f32 %v927_v26  ;;  %v462_v43 = vadd.f32 1.0, %v1190_v37  ;;  %v944_v37 = vmul.f32 -1.442695, %v256_v20 }
  0x92   :  { %v1194_v45 = vpop.eup %1193  ;;  %1017 = vmatpush3.bf16.xpose.msra.mxu0 %v1014_v33  ;;  %1213 = vpow2.f32 %v942_v30  ;;  %v463_v47 = vadd.f32 1.0, %v1192_v40  ;;  %v929_v33 = vmul.f32 -1.442695, %v241_v16  ;;  %v898_v57 = vmul.f32 -1.442695, %v210_v38  ;;  %v127_v16 = vld [vmem:[#allocation5 + $0x1d8] sm:$0xff] }
  0x93   :  { %v1196_v51 = vpop.eup %1195  ;;  %v668_v53 = vmul.f32 %v1194_v45, %v92_v39  ;;  %1215 = vpow2.f32 %v943_v34  ;;  %v79_v45 = vld [vmem:[#allocation5 + $0x58] sm:$0xff] }
  0x94   :  { %v1198_v55 = vpop.eup %1197  ;;  %v669_v56 = vmul.f32 %v1196_v51, %v93_v41  ;;  %1217 = vrcp.f32 %v462_v43  ;;  %v945_v41 = vmul.f32 -1.442695, %v257_v24  ;;  %v211_v43 = vsub.f32 0.0, %v147_v29  ;;  %v163_v51 = vld [vmem:[#allocation7 + $0xf8] sm:$0xff] }
  0x95   :  { %v1200_v58 = vpop.eup %1199  ;;  %v684_v59 = vmul.f32 %v1198_v55, %v108_v46  ;;  %v732_v60 = vadd.f32 %v668_v53, %v652_v42  ;;  %1219 = vrcp.f32 %v463_v47  ;;  %v162_v42 = vld [vmem:[#allocation7 + $0xf0] sm:$0xff] }
  0x96   :  { %v1202_v62 = vpop.eup %1201  ;;  %v478_v0 = vadd.f32 1.0, %v1200_v58  ;;  %1221 = vpow2.f32 %v896_v50  ;;  %v735_v4 = vadd.f32 %v669_v56, %v653_v52  ;;  %v94_v46 = vld [vmem:[#allocation5 + $0xd0] sm:$0xff]  ;;  %v226_v56 = vsub.f32 0.0, %v162_v42 }
  0x97   :  { %v1204_v2 = vpop.eup %1203  ;;  %v479_v5 = vadd.f32 1.0, %v1202_v62  ;;  %1223 = vpow2.f32 %v897_v54  ;;  %v733_v10 = vadd.f32 %v732_v60, %v684_v59  ;;  %v110_v53 = vld [vmem:[#allocation5 + $0x150] sm:$0xff]  ;;  %v899_v61 = vmul.f32 -1.442695, %v211_v43 }
  0x98   :  { %v1206_v8 = vpop.eup %1205  ;;  %v494_v11 = vadd.f32 1.0, %v1204_v2  ;;  %1225 = vrcp.f32 %v478_v0  ;;  %v178_v55 = vld [vmem:[#allocation7 + $0x170] sm:$0xff]  ;;  %v227_v0 = vsub.f32 0.0, %v163_v51 }
  0x99   :  { %v1208_v14 = vpop.eup %1207  ;;  %v685_v15 = vmul.f32 %v1206_v8, %v109_v63  ;;  %1227 = vrcp.f32 %v479_v5  ;;  %v179_v8 = vld [vmem:[#allocation7 + $0x178] sm:$0xff] }
  0x9a   :  { %v1210_v18 = vpop.eup %1209  ;;  %v700_v19 = vmul.f32 %v1208_v14, %v124_v3  ;;  %1229 = vrcp.f32 %v494_v11  ;;  %v914_v14 = vmul.f32 -1.442695, %v226_v56  ;;  %v915_v20 = vmul.f32 -1.442695, %v227_v0 }
  0x9b   :  { %v1212_v21 = vpop.eup %1211  ;;  %v701_v22 = vmul.f32 %v1210_v18, %v125_v9  ;;  %v736_v23 = vadd.f32 %v735_v4, %v685_v15  ;;  %1231 = vpow2.f32 %v912_v7  ;;  %v242_v4 = vsub.f32 0.0, %v178_v55 }
  0x9c   :  { %v1214_v26 = vpop.eup %1213  ;;  %v734_v27 = vadd.f32 %v733_v10, %v700_v19  ;;  %v495_v28 = vadd.f32 1.0, %v1212_v21  ;;  %1233 = vpow2.f32 %v913_v13  ;;  %v126_v10 = vld [vmem:[#allocation5 + $0x1d0] sm:$0xff]  ;;  %v195_v19 = vld [vmem:[#allocation7 + $0x1f8] sm:$0xff] }
  0x9d   :  { %v1216_v30 = vpop.eup %1215  ;;  %v737_v31 = vadd.f32 %v736_v23, %v701_v22  ;;  %v510_v32 = vadd.f32 1.0, %v1214_v26  ;;  %1235 = vpow2.f32 %v928_v17  ;;  %v194_v13 = vld [vmem:[#allocation7 + $0x1f0] sm:$0xff]  ;;  %v243_v23 = vsub.f32 0.0, %v179_v8  ;;  %v129_v8 = vld [vmem:[#allocation5 + $0x1e8] sm:$0xff] }
  0x9e   :  { %v1218_v34 = vpop.eup %1217  ;;  %v511_v36 = vadd.f32 1.0, %v1216_v30  ;;  %1237 = vrcp.f32 %v495_v28  ;;  %v930_v24 = vmul.f32 -1.442695, %v242_v4  ;;  %v128_v4 = vld [vmem:[#allocation5 + $0x1e0] sm:$0xff] }
  0x9f   :  { %v1220_v39 = vpop.eup %1219  ;;  %v1018_v40 = vpack.c.bf16 %v737_v31, %v734_v27  ;;  %1239 = vrcp.f32 %v510_v32  ;;  %v654_v49 = vmul.f32 %v1218_v34, %v78_v35  ;;  %v258_v27 = vsub.f32 0.0, %v194_v13 }
  0xa0   :  { %v1222_v44 = vpop.eup %1221  ;;  %1241 = vrcp.f32 %v511_v36  ;;  %v655_v59 = vmul.f32 %v1220_v39, %v79_v45  ;;  %v259_v31 = vsub.f32 0.0, %v195_v19  ;;  %v931_v38 = vmul.f32 -1.442695, %v243_v23 }
  0xa1   :  { %v1224_v47 = vpop.eup %1223  ;;  %1019 = vmatprep.subr.bf16.mxu0 %v1018_v40  ;;  %1243 = vpow2.f32 %v929_v33  ;;  %v464_v50 = vadd.f32 1.0, %v1222_v44  ;;  %v946_v42 = vmul.f32 -1.442695, %v258_v27 }
  0xa2   :  { %v1226_v52 = vpop.eup %1225  ;;  %1021 = vmatpush3.bf16.xpose.msra.mxu0 %v1018_v40  ;;  %1245 = vpow2.f32 %v944_v37  ;;  %v465_v54 = vadd.f32 1.0, %v1224_v47  ;;  %v80_v40 = vld [vmem:[#allocation5 + $0x60] sm:$0xff]  ;;  %v947_v45 = vmul.f32 -1.442695, %v259_v31  ;;  %v81_v47 = vld [vmem:[#allocation5 + $0x68] sm:$0xff]  ;;  %v99_v31 = vld [vmem:[#allocation5 + $0xf8] sm:$0xff] }
  0xa3   :  { %v1228_v58 = vpop.eup %1227  ;;  %v670_v60 = vmul.f32 %v1226_v52, %v94_v46  ;;  %1247 = vpow2.f32 %v945_v41 }
  0xa4   :  { %v1230_v62 = vpop.eup %1229  ;;  %v671_v63 = vmul.f32 %v1228_v58, %v95_v48  ;;  %1249 = vrcp.f32 %v464_v50  ;;  %v96_v48 = vld [vmem:[#allocation5 + $0xe0] sm:$0xff]  ;;  %v97_v50 = vld [vmem:[#allocation5 + $0xe8] sm:$0xff] }
  0xa5   :  { %v1232_v1 = vpop.eup %1231  ;;  %v686_v2 = vmul.f32 %v1230_v62, %v110_v53  ;;  %v738_v3 = vadd.f32 %v670_v60, %v654_v49  ;;  %1251 = vrcp.f32 %v465_v54  ;;  %v112_v54 = vld [vmem:[#allocation5 + $0x160] sm:$0xff] }
  0xa6   :  { %v1234_v5 = vpop.eup %1233  ;;  %v480_v7 = vadd.f32 1.0, %v1232_v1  ;;  %1253 = vpow2.f32 %v898_v57  ;;  %v741_v11 = vadd.f32 %v671_v63, %v655_v59  ;;  %v113_v1 = vld [vmem:[#allocation5 + $0x168] sm:$0xff] }
  0xa7   :  { %v1236_v9 = vpop.eup %1235  ;;  %v481_v12 = vadd.f32 1.0, %v1234_v5  ;;  %1255 = vpow2.f32 %v899_v61  ;;  %v739_v17 = vadd.f32 %v738_v3, %v686_v2 }
  0xa8   :  { %v1238_v15 = vpop.eup %1237  ;;  %v496_v18 = vadd.f32 1.0, %v1236_v9  ;;  %1257 = vrcp.f32 %v480_v7 }
  0xa9   :  { %v1240_v21 = vpop.eup %1239  ;;  %v687_v22 = vmul.f32 %v1238_v15, %v111_v6  ;;  %1259 = vrcp.f32 %v481_v12 }
  0xaa   :  { %v1242_v25 = vpop.eup %1241  ;;  %v702_v26 = vmul.f32 %v1240_v21, %v126_v10  ;;  %1261 = vrcp.f32 %v496_v18 }
  0xab   :  { %v1244_v28 = vpop.eup %1243  ;;  %v703_v29 = vmul.f32 %v1242_v25, %v127_v16  ;;  %v742_v30 = vadd.f32 %v741_v11, %v687_v22  ;;  %1263 = vpow2.f32 %v914_v14  ;;  %v82_v25 = vld [vmem:[#allocation5 + $0x70] sm:$0xff] }
  0xac   :  { %v1246_v32 = vpop.eup %1245  ;;  %v740_v33 = vadd.f32 %v739_v17, %v702_v26  ;;  %v497_v34 = vadd.f32 1.0, %v1244_v28  ;;  %1265 = vpow2.f32 %v915_v20 }
  0xad   :  { %v1248_v35 = vpop.eup %1247  ;;  %v743_v36 = vadd.f32 %v742_v30, %v703_v29  ;;  %v512_v37 = vadd.f32 1.0, %v1246_v32  ;;  %1267 = vpow2.f32 %v930_v24  ;;  %v83_v29 = vld [vmem:[#allocation5 + $0x78] sm:$0xff]  ;;  %v98_v30 = vld [vmem:[#allocation5 + $0xf0] sm:$0xff] }
  0xae   :  { %v1250_v39 = vpop.eup %1249  ;;  %v513_v41 = vadd.f32 1.0, %v1248_v35  ;;  %1269 = vrcp.f32 %v497_v34  ;;  %v114_v34 = vld [vmem:[#allocation5 + $0x170] sm:$0xff] }
  0xaf   :  { %v1252_v43 = vpop.eup %1251  ;;  %v1022_v44 = vpack.c.bf16 %v743_v36, %v740_v33  ;;  %1271 = vrcp.f32 %v512_v37  ;;  %v656_v51 = vmul.f32 %v1250_v39, %v80_v40 }
  0xb0   :  { %v1254_v46 = vpop.eup %1253  ;;  %1273 = vrcp.f32 %v513_v41  ;;  %v657_v57 = vmul.f32 %v1252_v43, %v81_v47  ;;  %v130_v43 = vld [vmem:[#allocation5 + $0x1f0] sm:$0xff] }
  0xb1   :  { %v1256_v49 = vpop.eup %1255  ;;  %1023 = vmatprep.subr.bf16.mxu0 %v1022_v44  ;;  %1275 = vpow2.f32 %v931_v38  ;;  %v466_v52 = vadd.f32 1.0, %v1254_v46  ;;  %v131_v46 = vld [vmem:[#allocation5 + $0x1f8] sm:$0xff] }
  0xb2   :  { %v1258_v53 = vpop.eup %1257  ;;  %1025 = vmatpush3.bf16.xpose.msra.mxu0 %v1022_v44  ;;  %1277 = vpow2.f32 %v946_v42  ;;  %v467_v55 = vadd.f32 1.0, %v1256_v49  ;;  %v115_v42 = vld [vmem:[#allocation5 + $0x178] sm:$0xff] }
  0xb3   :  { %v1260_v56 = vpop.eup %1259  ;;  %v672_v58 = vmul.f32 %v1258_v53, %v96_v48  ;;  %1279 = vpow2.f32 %v947_v45 }
  0xb4   :  { %v1262_v59 = vpop.eup %1261  ;;  %v673_v60 = vmul.f32 %v1260_v56, %v97_v50  ;;  %1281 = vrcp.f32 %v466_v52 }
  0xb5   :  { %v1264_v61 = vpop.eup %1263  ;;  %v688_v62 = vmul.f32 %v1262_v59, %v112_v54  ;;  %v744_v63 = vadd.f32 %v672_v58, %v656_v51  ;;  %1283 = vrcp.f32 %v467_v55  ;;  %v845_v58 = vld [vmem:[%s1508_s4] sm:$0xf]  ;;  %s1400_s4 = smov [#allocation8]  }
  0xb6   :  { %v1266_v0 = vpop.eup %1265  ;;  %v482_v2 = vadd.f32 1.0, %v1264_v61  ;;  %v747_v5 = vadd.f32 %v673_v60, %v657_v57  ;;  %v759_v57 = vld [vmem:[#allocation2 + $0x8] sm:$0xff]  ;;  %v846_v59 = vsub.f32 0.0, %v845_v58  ;;  %s871_s9 = sshll.u32 %s1400_s4, 4  ;;  %s872_s9 = int_to_ptr.vmem [resolvable:$true] %s871_s9 }
  0xb7   :  { %v1268_v3 = vpop.eup %1267  ;;  %v483_v6 = vadd.f32 1.0, %v1266_v0  ;;  %v745_v9 = vadd.f32 %v744_v63, %v688_v62  ;;  %v844_v0 = vld [vmem:[%s1507_s3] sm:$0xf]  ;;  %s1367_s10 = scalar_lea.vmem %s872_s9, 256  ;;  %p1372_p11 = scmp.lt.s32.totalorder %s872_s9, %s872_s9 }
  0xb8   :  { %v1270_v7 = vpop.eup %1269  ;;  %v498_v10 = vadd.f32 1.0, %v1268_v3  ;;  %1285 = vrcp.f32 %v482_v2  ;;  %v948_v60 = vmul.f32 -1.442695, %v846_v59  ;;  %p1368_p10 = scmp.ne.s32.totalorder %s872_s9, %s1367_s10  ;;  %p1373_p12 = scmp.lt.s32.totalorder %s1367_s10, %s1367_s10 }
  0xb9   :  { %v1272_v11 = vpop.eup %1271  ;;  %v689_v12 = vmul.f32 %v1270_v7, %v113_v1  ;;  %1287 = vrcp.f32 %v483_v6 }
  0xba   :  { %v1274_v13 = vpop.eup %1273  ;;  %v704_v14 = vmul.f32 %v1272_v11, %v128_v4  ;;  %1289 = vrcp.f32 %v498_v10  ;;  %p1374_p13 = por %p1373_p12, %p1372_p11 }
  0xbb   :  { %v1276_v15 = vpop.eup %1275  ;;  %v705_v16 = vmul.f32 %v1274_v13, %v129_v8  ;;  %v748_v17 = vadd.f32 %v747_v5, %v689_v12 }
  0xbc   :  { %v1278_v18 = vpop.eup %1277  ;;  %v746_v19 = vadd.f32 %v745_v9, %v704_v14  ;;  %v499_v20 = vadd.f32 1.0, %v1276_v15  ;;  %p1375_p0 = pnand %p1374_p13, %p1368_p10 }
  0xbd   :  { %v1280_v21 = vpop.eup %1279  ;;  %v749_v22 = vadd.f32 %v748_v17, %v705_v16  ;;  %v514_v23 = vadd.f32 1.0, %v1278_v18 }
  0xbe   :  { %v1282_v24 = vpop.eup %1281  ;;  %v515_v26 = vadd.f32 1.0, %v1280_v21  ;;  %1291 = vrcp.f32 %v499_v20 }
  0xbf   :  { %v1026_v27 = vpack.c.bf16 %v749_v22, %v746_v19  ;;  %1293 = vrcp.f32 %v514_v23  ;;  %v1284_v28 = vpop.eup %1283  ;;  %v658_v32 = vmul.f32 %v1282_v24, %v82_v25 }
  0xc0   :  { %1295 = vrcp.f32 %v515_v26  ;;  %v659_v36 = vmul.f32 %v1284_v28, %v83_v29 }
  0xc1   :  { %1027 = vmatprep.subr.bf16.mxu0 %v1026_v27  ;;  %1297 = vpow2.f32 %v948_v60 }
  0xc2   :  { %v1286_v33 = vpop.eup %1285  ;;  %1029 = vmatpush3.bf16.xpose.msra.mxu0 %v1026_v27 }
  0xc3   :  { %v1288_v35 = vpop.eup %1287  ;;  %v674_v37 = vmul.f32 %v1286_v33, %v98_v30 }
  0xc4   :  { %v1290_v38 = vpop.eup %1289  ;;  %v675_v39 = vmul.f32 %v1288_v35, %v99_v31 }
  0xc5   :  { %v690_v40 = vmul.f32 %v1290_v38, %v114_v34  ;;  %v750_v41 = vadd.f32 %v674_v37, %v658_v32 }
  0xc6   :  { %v753_v44 = vadd.f32 %v675_v39, %v659_v36 }
  0xc7   :  { %v751_v47 = vadd.f32 %v750_v41, %v690_v40 }
  0xc8   :  { %v1292_v45 = vpop.eup %1291 }
  0xc9   :  { %v1294_v48 = vpop.eup %1293  ;;  %v691_v49 = vmul.f32 %v1292_v45, %v115_v42 }
  0xca   :  { %v1296_v50 = vpop.eup %1295  ;;  %v706_v51 = vmul.f32 %v1294_v48, %v130_v43 }
  0xcb   :  { %v707_v52 = vmul.f32 %v1296_v50, %v131_v46  ;;  %v754_v53 = vadd.f32 %v753_v44, %v691_v49  ;;  %v1298_v61 = vpop.eup %1297 }
  0xcc   :  { %v752_v54 = vadd.f32 %v751_v47, %v706_v51  ;;  %v850_v62 = vadd.f32 1.0, %v1298_v61 }
  0xcd   :  { %v755_v55 = vadd.f32 %v754_v53, %v707_v52 }
  0xce   :  { %1299 = vrcp.f32 %v850_v62 }
  0xcf   :  { %v1030_v56 = vpack.c.bf16 %v755_v55, %v752_v54 }
  0xd1   :  { %1031 = vmatprep.subr.bf16.mxu0 %v1030_v56 }
  0xd2   :  { %1033 = vmatpush3.bf16.xpose.msra.mxu0 %v1030_v56 }
  0xd8   :  { %v1300_v63 = vpop.eup %1299 }
  0xd9   :  { %1000 = vmatmul.mubr.f32.vlgmr.msra.gmra.mrb[0].mxu0 %v759_v57  ;;  %v853_v1 = vmul.f32 %v1300_v63, %v844_v0 }
  0xdb   :  { %v855_v2 = vsel %vm854_vm0, %v853_v1, 0.0 }
  0xdc   :  { %v856_v3 = vrot.slane %v855_v2, 4 }
  0xde   :  { %v857_v4 = vadd.f32 %v856_v3, %v855_v2 }
  0xe0   :  { %v858_v5 = vrot.slane %v857_v4, 2 }
  0xe2   :  { %v859_v6 = vadd.f32 %v858_v5, %v857_v4 }
  0xe4   :  { %v860_v7 = vrot.slane %v859_v6, 1 }
  0xe6   :  { %v861_v8 = vadd.f32 %v860_v7, %v859_v6 }
 0x1ac   :  { %v1001_v9 = vpop.f32.mrb[0].mxu0 }
 0x1ad   :  { %v826_v10 = vpop.f32.mrb[1].mxu0  ;;  %v863_v11 = vadd.f32 %v1001_v9, %v861_v8 }
 0x1ae   :  { %v862_v12 = vadd.f32 %v861_v8, %v826_v10 }
 0x1af   :  { %865 = vst [vmem:[#allocation8 + $0x8] sm:$0xff] %v863_v11 }
 0x1b0   :  { %864 = vst [vmem:[#allocation8] sm:$0xff] %v862_v12 }
 0x1b1   :  { %1378 = shalt.err (!%p1375_p0)
}
 0x1b2   :  { %s1379_s12 = scalar_lea.hbm %s1509_s5, 256 }
 0x1b3   :  { %p1380_p1 = scmp.ne.s32.totalorder %s1509_s5, %s1379_s12  ;;  %p1383_p2 = scmp.lt.u32.totalorder %s1379_s12, %s1509_s5 }
 0x1b5   :  { %p1385_p3 = pnand %p1383_p2, %p1380_p1 }
 0x1b7   :  { %1388 = shalt.err (!%p1385_p3)
}
 0x1b8   :  { %877 = dma.vmem_to_hbm [thread:$0]  %s872_s9, 256, %s1509_s5, [#allocation4], %s1397_s30, %s1397_s30, %s1398_s6  }
 0x1b9   :  { %1393 = dma.done.wait [#allocation4], 256  }
 0x1ba   :  { %1394 = vsyncadd [#allocation4], 4294967040 }
 0x1bb   :  { %881 = vsyncpa [#allocation3], 1 }
 0x1bc   :  { %882 = vsyncpa [#allocation6], 1 }
 0x1bd   :  { %883 = vsyncpa [#allocation4], 1 }

</bundles_post_ra>
